<compile_context>
chip_gen: v6e
topology: v6e:2x2x1
jax: 0.10.0
libtpu: 0.0.40
codegen_flags: <defaults>
</compile_context>

<pallas_src>
import functools

import jax
import jax.numpy as jnp
import numpy as np
from jax.experimental import pallas as pl
from jax.experimental.pallas import tpu as pltpu


_VMEM_LIMIT = 32 * 1024 * 1024      # explicit scoped-VMEM limit; safe on v5e/v6e/v7x
_MAX_UNROLL = 64                    # cap on slabs per block (kernel-body unroll size)
_BLOCK_BYTES = 2 * 1024 * 1024      # default x-block budget (x2 for double buffering)


def _largest_divisor(n, cap):
    cap = max(1, min(n, cap))
    for d in range(cap, 0, -1):
        if n % d == 0:
            return d
    return 1


# --------------------------- pass 1: statistics ------------------------------

def _stats_kernel(shift_ref, x_ref, ssum_ref, csum_ref):
    """Accumulate per-group sum and second moment of shift-centred data.

    shift_ref: (G, 1)     per-group shift (approximate mean), f32
    x_ref:     (KB, G, L) block of channel slabs (row within a slab == group)
    ssum_ref:  (G, 1)     resident accumulator: sum (x - shift)
    csum_ref:  (G, G)     resident accumulator: sum (x - shift)(x - shift)^T
    """
    @pl.when(pl.program_id(0) == 0)
    def _init():
        ssum_ref[...] = jnp.zeros_like(ssum_ref)
        csum_ref[...] = jnp.zeros_like(csum_ref)

    shift = shift_ref[...]                                    # (G, 1) f32
    kb, g, _ = x_ref.shape
    s_acc = jnp.zeros((g, 1), jnp.float32)
    c_acc = jnp.zeros((g, g), jnp.float32)
    for k in range(kb):                                       # static unroll
        xk = x_ref[k].astype(jnp.float32) - shift             # (G, L)
        s_acc = s_acc + jnp.sum(xk, axis=1, keepdims=True)
        # xk @ xk.T: contract the lane (L) dim of both operands.
        c_acc = c_acc + jax.lax.dot_general(
            xk, xk, (((1,), (1,)), ((), ())),
            preferred_element_type=jnp.float32)
    ssum_ref[...] = ssum_ref[...] + s_acc
    csum_ref[...] = csum_ref[...] + c_acc


# ----------------------- pass 2: whiten + affine ------------------------------

def _apply_kernel(x_ref, mean_ref, wm_ref, w_ref, b_ref, y_ref):
    """y = wm @ (x - mean) per slab, then per-channel affine.

    x_ref:  (1, JB, G, L)  JB channel-slabs of one batch element
    mean_ref: (G, 1)       group means, f32
    wm_ref:   (G, G)       whitening matrix, f32
    w_ref/b_ref: (JB, G, 1) per-channel affine parameters
    y_ref:  (1, JB, G, L)  output block, original layout
    """
    mean = mean_ref[...]
    wm = wm_ref[...]
    jb = x_ref.shape[1]
    for k in range(jb):                                       # static unroll
        xc = x_ref[0, k].astype(jnp.float32) - mean           # (G, L)
        yk = jnp.dot(wm, xc, preferred_element_type=jnp.float32)
        y_ref[0, k] = (yk * w_ref[k] + b_ref[k]).astype(y_ref.dtype)


# --------------------------------- wrapper ------------------------------------

def batch_group_itn(x, weight, bias, *, num_groups, T=5, eps=1e-5,
                    block_bytes=_BLOCK_BYTES):
    """Training-mode forward of BatchGroupItN for dim=3 (B, C, L) inputs."""
    B, C, L = x.shape
    G = num_groups
    assert C % G == 0
    NJ = C // G                    # channel slabs per batch element
    NK = B * NJ                    # total channel slabs
    m_total = NK * L               # samples per group

    slab_bytes = G * L * x.dtype.itemsize
    max_slabs = max(1, min(_MAX_UNROLL, block_bytes // max(1, slab_bytes)))
    KB = _largest_divisor(NK, max_slabs)       # slabs per stats block
    JB = _largest_divisor(NJ, max_slabs)       # slabs per apply block

    x3 = x.reshape(NK, G, L)                   # free reshape, no HBM transpose
    # per-group mean of the first slab: cheap stabiliser for the covariance
    shift = jnp.mean(x3[0].astype(jnp.float32), axis=-1, keepdims=True)  # (G,1)

    ssum, csum = pl.pallas_call(
        _stats_kernel,
        out_shape=(jax.ShapeDtypeStruct((G, 1), jnp.float32),
                   jax.ShapeDtypeStruct((G, G), jnp.float32)),
        grid=(NK // KB,),
        in_specs=[
            pl.BlockSpec((G, 1), lambda i: (0, 0)),
            pl.BlockSpec((KB, G, L), lambda i: (i, 0, 0)),
        ],
        out_specs=[
            pl.BlockSpec((G, 1), lambda i: (0, 0)),
            pl.BlockSpec((G, G), lambda i: (0, 0)),
        ],
        compiler_params=pltpu.CompilerParams(
            dimension_semantics=("arbitrary",),
            vmem_limit_bytes=_VMEM_LIMIT),
    )(shift, x3)

    # ---- tiny O(G^2)/O(T*G^3) glue in plain JAX (off the streaming path) ----
    eye = jnp.eye(G, dtype=jnp.float32)
    mean_c = ssum / jnp.float32(m_total)             # mean of shift-centred data
    mean = shift + mean_c                            # true per-group mean (G, 1)
    sigma = (csum / jnp.float32(m_total)
             - mean_c @ mean_c.T + jnp.float32(eps) * eye)
    trace_inv = 1.0 / jnp.trace(sigma)
    sigma_n = sigma * trace_inv
    P = eye
    for _ in range(T):
        P = 1.5 * P - 0.5 * (P @ P @ P) @ sigma_n
    wm = P * jnp.sqrt(trace_inv)                     # whitening matrix (G, G)
    # TODO(synk): running_mean / running_projection EMA updates (module state)
    # are not emitted; `mean` and `wm` above are the values they would consume.

    x4 = x.reshape(B, NJ, G, L)                      # free reshape
    w_g = weight.reshape(NJ, G, 1).astype(jnp.float32)
    b_g = bias.reshape(NJ, G, 1).astype(jnp.float32)

    y4 = pl.pallas_call(
        _apply_kernel,
        out_shape=jax.ShapeDtypeStruct((B, NJ, G, L), x.dtype),
        grid=(B, NJ // JB),
        in_specs=[
            pl.BlockSpec((1, JB, G, L), lambda b, j: (b, j, 0, 0)),
            pl.BlockSpec((G, 1), lambda b, j: (0, 0)),
            pl.BlockSpec((G, G), lambda b, j: (0, 0)),
            pl.BlockSpec((JB, G, 1), lambda b, j: (j, 0, 0)),
            pl.BlockSpec((JB, G, 1), lambda b, j: (j, 0, 0)),
        ],
        out_specs=pl.BlockSpec((1, JB, G, L), lambda b, j: (b, j, 0, 0)),
        compiler_params=pltpu.CompilerParams(
            dimension_semantics=("parallel", "parallel"),
            vmem_limit_bytes=_VMEM_LIMIT),
    )(x4, mean, wm, w_g, b_g)

    return y4.reshape(B, C, L)


# ------------------------- pure-JAX reference (check) -------------------------

def _to_gm(a, G):
    B, C, L = a.shape
    return a.reshape(B * C // G, G, L).transpose(1, 0, 2).reshape(G, -1)


def _from_gm(y, B, C, L, G):
    return y.reshape(G, B * C // G, L).transpose(1, 0, 2).reshape(B, C, L)


def _reference(x, weight, bias, *, num_groups, T=5, eps=1e-5):
    B, C, L = x.shape
    G = num_groups
    xm = _to_gm(x, G).astype(jnp.float32)
    _, m = xm.shape
    mean = xm.mean(axis=1, keepdims=True)
    xc = xm - mean
    sigma = xc @ xc.T / m + eps * jnp.eye(G, dtype=jnp.float32)
    trace_inv = 1.0 / jnp.trace(sigma)
    sigma_n = sigma * trace_inv
    P = jnp.eye(G, dtype=jnp.float32)
    for _ in range(T):
        P = 1.5 * P - 0.5 * (P @ P @ P) @ sigma_n
    wm = P * jnp.sqrt(trace_inv)
    y = wm @ xc
    out = _from_gm(y, B, C, L, G)
    return out * weight.reshape(1, C, 1) + bias.reshape(1, C, 1)


# ----------------------------------- main --------------------------------------

if __name__ == "__main__":
    B, C, L = 2, 32, 128          # dim=3 module: (batch, num_features, seq)
    num_groups = 8
    T, eps = 5, 1e-5

    key = jax.random.PRNGKey(0)
    kx, kw, kb = jax.random.split(key, 3)
    x = jax.random.normal(kx, (B, C, L), dtype=jnp.float32)
    # reset_parameters() gives ones/zeros; non-trivial affine exercises the
    # per-channel parameter plumbing as well.
    weight = 1.0 + 0.1 * jax.random.normal(kw, (C,), dtype=jnp.float32)
    bias = 0.1 * jax.random.normal(kb, (C,), dtype=jnp.float32)

    ref = _reference(x, weight, bias, num_groups=num_groups, T=T, eps=eps)

    # (a) default large blocks; (b) tiny blocks to also exercise the multi-step
    #     accumulation / multi-block apply paths at these small shapes.
    for blk in (_BLOCK_BYTES, 8192):
        fn = jax.jit(functools.partial(
            batch_group_itn, num_groups=num_groups, T=T, eps=eps,
            block_bytes=blk))
        out = jax.block_until_ready(fn(x, weight, bias))
        np.testing.assert_allclose(np.asarray(out), np.asarray(ref),
                                   rtol=1e-4, atol=1e-4)

    print("KERNEL_OK")
</pallas_src>

<mosaic_0001>
module attributes {stable_mosaic.version = 11 : i64} {
  func.func @_stats_kernel(%arg0: i32, %arg1: memref<8x1xf32, #tpu.memory_space<vmem>>, %arg2: memref<8x8x128xf32, #tpu.memory_space<vmem>>, %arg3: memref<8x1xf32, #tpu.memory_space<vmem>>, %arg4: memref<8x8xf32, #tpu.memory_space<vmem>>) attributes {dimension_semantics = [#tpu.dimension_semantics<arbitrary>], iteration_bounds = array<i64: 1>, scalar_prefetch = 0 : i64, scratch_operands = 0 : i64, tpu.core_type = #tpu.core_type<tc>, window_params = [{pipeline_mode = #tpu.pipeline_mode<synchronous>, transform_indices = @transform_0, window_bounds = array<i64: 8, 1>}, {transform_indices = @transform_1, window_bounds = array<i64: 8, 8, 128>}, {pipeline_mode = #tpu.pipeline_mode<synchronous>, transform_indices = @transform_2, window_bounds = array<i64: 8, 1>}, {pipeline_mode = #tpu.pipeline_mode<synchronous>, transform_indices = @transform_3, window_bounds = array<i64: 8, 8>}]} {
    %c0_i32 = arith.constant 0 : i32
    %0 = arith.cmpi eq, %arg0, %c0_i32 : i32
    %1 = arith.extui %0 : i1 to i32
    %c0_i32_0 = arith.constant 0 : i32
    %2 = arith.cmpi ne, %1, %c0_i32_0 : i32
    scf.if %2 {
      %cst_44 = arith.constant 0.000000e+00 : f32
      %84 = vector.broadcast %cst_44 : f32 to vector<8x1xf32>
      %c0_45 = arith.constant 0 : index
      %c0_46 = arith.constant 0 : index
      %85 = vector.load %arg3[%c0_45, %c0_46] : memref<8x1xf32, #tpu.memory_space<vmem>>, vector<8x1xf32>
      tpu.vector_store %arg3[%c0_45, %c0_46], %84 {strides = array<i32>} : memref<8x1xf32, #tpu.memory_space<vmem>>, vector<8x1xf32>,
      %cst_47 = arith.constant 0.000000e+00 : f32
      %86 = vector.broadcast %cst_47 : f32 to vector<8x8xf32>
      %c0_48 = arith.constant 0 : index
      %c0_49 = arith.constant 0 : index
      %87 = vector.load %arg4[%c0_48, %c0_49] : memref<8x8xf32, #tpu.memory_space<vmem>>, vector<8x8xf32>
      tpu.vector_store %arg4[%c0_48, %c0_49], %86 {strides = array<i32>} : memref<8x8xf32, #tpu.memory_space<vmem>>, vector<8x8xf32>,
    } else {
    }
    %c0 = arith.constant 0 : index
    %c0_1 = arith.constant 0 : index
    %3 = vector.load %arg1[%c0, %c0_1] : memref<8x1xf32, #tpu.memory_space<vmem>>, vector<8x1xf32>
    %cst = arith.constant 0.000000e+00 : f32
    %4 = vector.broadcast %cst : f32 to vector<8x1xf32>
    %cst_2 = arith.constant 0.000000e+00 : f32
    %5 = vector.broadcast %cst_2 : f32 to vector<8x8xf32>
    %c0_3 = arith.constant 0 : index
    %c0_4 = arith.constant 0 : index
    %c0_5 = arith.constant 0 : index
    %6 = vector.load %arg2[%c0_3, %c0_4, %c0_5] : memref<8x8x128xf32, #tpu.memory_space<vmem>>, vector<1x8x128xf32>
    %7 = vector.shape_cast %6 : vector<1x8x128xf32> to vector<8x128xf32>
    %8 = vector.broadcast %3 : vector<8x1xf32> to vector<8x128xf32>
    %9 = arith.subf %7, %8 : vector<8x128xf32>
    %cst_6 = arith.constant dense<0.000000e+00> : vector<8xf32>
    %10 = vector.multi_reduction <add>, %9, %cst_6 [1] : vector<8x128xf32> to vector<8xf32>
    %11 = vector.shape_cast %10 : vector<8xf32> to vector<8x1xf32>
    %12 = arith.addf %4, %11 : vector<8x1xf32>
    %cst_7 = arith.constant dense<0.000000e+00> : vector<8x8xf32>
    %13 = tpu.matmul %9, %9, %cst_7 {dimension_numbers = #tpu.dot_dimension_numbers<[1], [1], [0], [0], [0, 0, 1, 0], [], []>} : vector<8x128xf32>, vector<8x128xf32>, vector<8x8xf32> -> vector<8x8xf32>
    %14 = arith.addf %5, %13 : vector<8x8xf32>
    %c1 = arith.constant 1 : index
    %c0_8 = arith.constant 0 : index
    %c0_9 = arith.constant 0 : index
    %15 = vector.load %arg2[%c1, %c0_8, %c0_9] : memref<8x8x128xf32, #tpu.memory_space<vmem>>, vector<1x8x128xf32>
    %16 = vector.shape_cast %15 : vector<1x8x128xf32> to vector<8x128xf32>
    %17 = vector.broadcast %3 : vector<8x1xf32> to vector<8x128xf32>
    %18 = arith.subf %16, %17 : vector<8x128xf32>
    %cst_10 = arith.constant dense<0.000000e+00> : vector<8xf32>
    %19 = vector.multi_reduction <add>, %18, %cst_10 [1] : vector<8x128xf32> to vector<8xf32>
    %20 = vector.shape_cast %19 : vector<8xf32> to vector<8x1xf32>
    %21 = arith.addf %12, %20 : vector<8x1xf32>
    %cst_11 = arith.constant dense<0.000000e+00> : vector<8x8xf32>
    %22 = tpu.matmul %18, %18, %cst_11 {dimension_numbers = #tpu.dot_dimension_numbers<[1], [1], [0], [0], [0, 0, 1, 0], [], []>} : vector<8x128xf32>, vector<8x128xf32>, vector<8x8xf32> -> vector<8x8xf32>
    %23 = arith.addf %14, %22 : vector<8x8xf32>
    %c2 = arith.constant 2 : index
    %c0_12 = arith.constant 0 : index
    %c0_13 = arith.constant 0 : index
    %24 = vector.load %arg2[%c2, %c0_12, %c0_13] : memref<8x8x128xf32, #tpu.memory_space<vmem>>, vector<1x8x128xf32>
    %25 = vector.shape_cast %24 : vector<1x8x128xf32> to vector<8x128xf32>
    %26 = vector.broadcast %3 : vector<8x1xf32> to vector<8x128xf32>
    %27 = arith.subf %25, %26 : vector<8x128xf32>
    %cst_14 = arith.constant dense<0.000000e+00> : vector<8xf32>
    %28 = vector.multi_reduction <add>, %27, %cst_14 [1] : vector<8x128xf32> to vector<8xf32>
    %29 = vector.shape_cast %28 : vector<8xf32> to vector<8x1xf32>
    %30 = arith.addf %21, %29 : vector<8x1xf32>
    %cst_15 = arith.constant dense<0.000000e+00> : vector<8x8xf32>
    %31 = tpu.matmul %27, %27, %cst_15 {dimension_numbers = #tpu.dot_dimension_numbers<[1], [1], [0], [0], [0, 0, 1, 0], [], []>} : vector<8x128xf32>, vector<8x128xf32>, vector<8x8xf32> -> vector<8x8xf32>
    %32 = arith.addf %23, %31 : vector<8x8xf32>
    %c3 = arith.constant 3 : index
    %c0_16 = arith.constant 0 : index
    %c0_17 = arith.constant 0 : index
    %33 = vector.load %arg2[%c3, %c0_16, %c0_17] : memref<8x8x128xf32, #tpu.memory_space<vmem>>, vector<1x8x128xf32>
    %34 = vector.shape_cast %33 : vector<1x8x128xf32> to vector<8x128xf32>
    %35 = vector.broadcast %3 : vector<8x1xf32> to vector<8x128xf32>
    %36 = arith.subf %34, %35 : vector<8x128xf32>
    %cst_18 = arith.constant dense<0.000000e+00> : vector<8xf32>
    %37 = vector.multi_reduction <add>, %36, %cst_18 [1] : vector<8x128xf32> to vector<8xf32>
    %38 = vector.shape_cast %37 : vector<8xf32> to vector<8x1xf32>
    %39 = arith.addf %30, %38 : vector<8x1xf32>
    %cst_19 = arith.constant dense<0.000000e+00> : vector<8x8xf32>
    %40 = tpu.matmul %36, %36, %cst_19 {dimension_numbers = #tpu.dot_dimension_numbers<[1], [1], [0], [0], [0, 0, 1, 0], [], []>} : vector<8x128xf32>, vector<8x128xf32>, vector<8x8xf32> -> vector<8x8xf32>
    %41 = arith.addf %32, %40 : vector<8x8xf32>
    %c4 = arith.constant 4 : index
    %c0_20 = arith.constant 0 : index
    %c0_21 = arith.constant 0 : index
    %42 = vector.load %arg2[%c4, %c0_20, %c0_21] : memref<8x8x128xf32, #tpu.memory_space<vmem>>, vector<1x8x128xf32>
    %43 = vector.shape_cast %42 : vector<1x8x128xf32> to vector<8x128xf32>
    %44 = vector.broadcast %3 : vector<8x1xf32> to vector<8x128xf32>
    %45 = arith.subf %43, %44 : vector<8x128xf32>
    %cst_22 = arith.constant dense<0.000000e+00> : vector<8xf32>
    %46 = vector.multi_reduction <add>, %45, %cst_22 [1] : vector<8x128xf32> to vector<8xf32>
    %47 = vector.shape_cast %46 : vector<8xf32> to vector<8x1xf32>
    %48 = arith.addf %39, %47 : vector<8x1xf32>
    %cst_23 = arith.constant dense<0.000000e+00> : vector<8x8xf32>
    %49 = tpu.matmul %45, %45, %cst_23 {dimension_numbers = #tpu.dot_dimension_numbers<[1], [1], [0], [0], [0, 0, 1, 0], [], []>} : vector<8x128xf32>, vector<8x128xf32>, vector<8x8xf32> -> vector<8x8xf32>
    %50 = arith.addf %41, %49 : vector<8x8xf32>
    %c5 = arith.constant 5 : index
    %c0_24 = arith.constant 0 : index
    %c0_25 = arith.constant 0 : index
    %51 = vector.load %arg2[%c5, %c0_24, %c0_25] : memref<8x8x128xf32, #tpu.memory_space<vmem>>, vector<1x8x128xf32>
    %52 = vector.shape_cast %51 : vector<1x8x128xf32> to vector<8x128xf32>
    %53 = vector.broadcast %3 : vector<8x1xf32> to vector<8x128xf32>
    %54 = arith.subf %52, %53 : vector<8x128xf32>
    %cst_26 = arith.constant dense<0.000000e+00> : vector<8xf32>
    %55 = vector.multi_reduction <add>, %54, %cst_26 [1] : vector<8x128xf32> to vector<8xf32>
    %56 = vector.shape_cast %55 : vector<8xf32> to vector<8x1xf32>
    %57 = arith.addf %48, %56 : vector<8x1xf32>
    %cst_27 = arith.constant dense<0.000000e+00> : vector<8x8xf32>
    %58 = tpu.matmul %54, %54, %cst_27 {dimension_numbers = #tpu.dot_dimension_numbers<[1], [1], [0], [0], [0, 0, 1, 0], [], []>} : vector<8x128xf32>, vector<8x128xf32>, vector<8x8xf32> -> vector<8x8xf32>
    %59 = arith.addf %50, %58 : vector<8x8xf32>
    %c6 = arith.constant 6 : index
    %c0_28 = arith.constant 0 : index
    %c0_29 = arith.constant 0 : index
    %60 = vector.load %arg2[%c6, %c0_28, %c0_29] : memref<8x8x128xf32, #tpu.memory_space<vmem>>, vector<1x8x128xf32>
    %61 = vector.shape_cast %60 : vector<1x8x128xf32> to vector<8x128xf32>
    %62 = vector.broadcast %3 : vector<8x1xf32> to vector<8x128xf32>
    %63 = arith.subf %61, %62 : vector<8x128xf32>
    %cst_30 = arith.constant dense<0.000000e+00> : vector<8xf32>
    %64 = vector.multi_reduction <add>, %63, %cst_30 [1] : vector<8x128xf32> to vector<8xf32>
    %65 = vector.shape_cast %64 : vector<8xf32> to vector<8x1xf32>
    %66 = arith.addf %57, %65 : vector<8x1xf32>
    %cst_31 = arith.constant dense<0.000000e+00> : vector<8x8xf32>
    %67 = tpu.matmul %63, %63, %cst_31 {dimension_numbers = #tpu.dot_dimension_numbers<[1], [1], [0], [0], [0, 0, 1, 0], [], []>} : vector<8x128xf32>, vector<8x128xf32>, vector<8x8xf32> -> vector<8x8xf32>
    %68 = arith.addf %59, %67 : vector<8x8xf32>
    %c7 = arith.constant 7 : index
    %c0_32 = arith.constant 0 : index
    %c0_33 = arith.constant 0 : index
    %69 = vector.load %arg2[%c7, %c0_32, %c0_33] : memref<8x8x128xf32, #tpu.memory_space<vmem>>, vector<1x8x128xf32>
    %70 = vector.shape_cast %69 : vector<1x8x128xf32> to vector<8x128xf32>
    %71 = vector.broadcast %3 : vector<8x1xf32> to vector<8x128xf32>
    %72 = arith.subf %70, %71 : vector<8x128xf32>
    %cst_34 = arith.constant dense<0.000000e+00> : vector<8xf32>
    %73 = vector.multi_reduction <add>, %72, %cst_34 [1] : vector<8x128xf32> to vector<8xf32>
    %74 = vector.shape_cast %73 : vector<8xf32> to vector<8x1xf32>
    %75 = arith.addf %66, %74 : vector<8x1xf32>
    %cst_35 = arith.constant dense<0.000000e+00> : vector<8x8xf32>
    %76 = tpu.matmul %72, %72, %cst_35 {dimension_numbers = #tpu.dot_dimension_numbers<[1], [1], [0], [0], [0, 0, 1, 0], [], []>} : vector<8x128xf32>, vector<8x128xf32>, vector<8x8xf32> -> vector<8x8xf32>
    %77 = arith.addf %68, %76 : vector<8x8xf32>
    %c0_36 = arith.constant 0 : index
    %c0_37 = arith.constant 0 : index
    %78 = vector.load %arg3[%c0_36, %c0_37] : memref<8x1xf32, #tpu.memory_space<vmem>>, vector<8x1xf32>
    %79 = arith.addf %78, %75 : vector<8x1xf32>
    %c0_38 = arith.constant 0 : index
    %c0_39 = arith.constant 0 : index
    %80 = vector.load %arg3[%c0_38, %c0_39] : memref<8x1xf32, #tpu.memory_space<vmem>>, vector<8x1xf32>
    tpu.vector_store %arg3[%c0_38, %c0_39], %79 {strides = array<i32>} : memref<8x1xf32, #tpu.memory_space<vmem>>, vector<8x1xf32>,
    %c0_40 = arith.constant 0 : index
    %c0_41 = arith.constant 0 : index
    %81 = vector.load %arg4[%c0_40, %c0_41] : memref<8x8xf32, #tpu.memory_space<vmem>>, vector<8x8xf32>
    %82 = arith.addf %81, %77 : vector<8x8xf32>
    %c0_42 = arith.constant 0 : index
    %c0_43 = arith.constant 0 : index
    %83 = vector.load %arg4[%c0_42, %c0_43] : memref<8x8xf32, #tpu.memory_space<vmem>>, vector<8x8xf32>
    tpu.vector_store %arg4[%c0_42, %c0_43], %82 {strides = array<i32>} : memref<8x8xf32, #tpu.memory_space<vmem>>, vector<8x8xf32>,
    return
  }
  func.func @transform_0(%arg0: i32) -> (i32, i32) {
    %c0_i32 = arith.constant 0 : i32
    %c0_i32_0 = arith.constant 0 : i32
    %c0_i32_1 = arith.constant 0 : i32
    return %c0_i32, %c0_i32_0 : i32, i32
  }
  func.func @transform_1(%arg0: i32) -> (i32, i32, i32) {
    %c0_i32 = arith.constant 0 : i32
    %c0_i32_0 = arith.constant 0 : i32
    %c0_i32_1 = arith.constant 0 : i32
    return %arg0, %c0_i32, %c0_i32_0 : i32, i32, i32
  }
  func.func @transform_2(%arg0: i32) -> (i32, i32) {
    %c0_i32 = arith.constant 0 : i32
    %c0_i32_0 = arith.constant 0 : i32
    %c0_i32_1 = arith.constant 0 : i32
    return %c0_i32, %c0_i32_0 : i32, i32
  }
  func.func @transform_3(%arg0: i32) -> (i32, i32) {
    %c0_i32 = arith.constant 0 : i32
    %c0_i32_0 = arith.constant 0 : i32
    %c0_i32_1 = arith.constant 0 : i32
    return %c0_i32, %c0_i32_0 : i32, i32
  }
}

module attributes {stable_mosaic.version = 11 : i64} {
  func.func @_apply_kernel(%arg0: i32, %arg1: i32, %arg2: memref<1x4x8x128xf32, #tpu.memory_space<vmem>>, %arg3: memref<8x1xf32, #tpu.memory_space<vmem>>, %arg4: memref<8x8xf32, #tpu.memory_space<vmem>>, %arg5: memref<4x8x1xf32, #tpu.memory_space<vmem>>, %arg6: memref<4x8x1xf32, #tpu.memory_space<vmem>>, %arg7: memref<1x4x8x128xf32, #tpu.memory_space<vmem>>) attributes {dimension_semantics = [#tpu.dimension_semantics<parallel>, #tpu.dimension_semantics<parallel>], iteration_bounds = array<i64: 2, 1>, scalar_prefetch = 0 : i64, scratch_operands = 0 : i64, tpu.core_type = #tpu.core_type<tc>, window_params = [{transform_indices = @transform_0, window_bounds = array<i64: 1, 4, 8, 128>}, {pipeline_mode = #tpu.pipeline_mode<synchronous>, transform_indices = @transform_1, window_bounds = array<i64: 8, 1>}, {pipeline_mode = #tpu.pipeline_mode<synchronous>, transform_indices = @transform_2, window_bounds = array<i64: 8, 8>}, {transform_indices = @transform_3, window_bounds = array<i64: 4, 8, 1>}, {transform_indices = @transform_4, window_bounds = array<i64: 4, 8, 1>}, {transform_indices = @transform_5, window_bounds = array<i64: 1, 4, 8, 128>}]} {
    %c0 = arith.constant 0 : index
    %c0_0 = arith.constant 0 : index
    %0 = vector.load %arg3[%c0, %c0_0] : memref<8x1xf32, #tpu.memory_space<vmem>>, vector<8x1xf32>
    %c0_1 = arith.constant 0 : index
    %c0_2 = arith.constant 0 : index
    %1 = vector.load %arg4[%c0_1, %c0_2] : memref<8x8xf32, #tpu.memory_space<vmem>>, vector<8x8xf32>
    %c0_3 = arith.constant 0 : index
    %c0_4 = arith.constant 0 : index
    %c0_5 = arith.constant 0 : index
    %c0_6 = arith.constant 0 : index
    %2 = vector.load %arg2[%c0_3, %c0_4, %c0_5, %c0_6] : memref<1x4x8x128xf32, #tpu.memory_space<vmem>>, vector<1x1x8x128xf32>
    %3 = vector.shape_cast %2 : vector<1x1x8x128xf32> to vector<8x128xf32>
    %4 = vector.broadcast %0 : vector<8x1xf32> to vector<8x128xf32>
    %5 = arith.subf %3, %4 : vector<8x128xf32>
    %cst = arith.constant dense<0.000000e+00> : vector<8x128xf32>
    %6 = tpu.matmul %1, %5, %cst {dimension_numbers = #tpu.dot_dimension_numbers<[1], [0], [0], [1], [0, 0, 1, 1], [], []>} : vector<8x8xf32>, vector<8x128xf32>, vector<8x128xf32> -> vector<8x128xf32>
    %c0_7 = arith.constant 0 : index
    %c0_8 = arith.constant 0 : index
    %c0_9 = arith.constant 0 : index
    %7 = vector.load %arg5[%c0_7, %c0_8, %c0_9] : memref<4x8x1xf32, #tpu.memory_space<vmem>>, vector<1x8x1xf32>
    %8 = vector.shape_cast %7 : vector<1x8x1xf32> to vector<8x1xf32>
    %9 = vector.broadcast %8 : vector<8x1xf32> to vector<8x128xf32>
    %10 = arith.mulf %6, %9 : vector<8x128xf32>
    %c0_10 = arith.constant 0 : index
    %c0_11 = arith.constant 0 : index
    %c0_12 = arith.constant 0 : index
    %11 = vector.load %arg6[%c0_10, %c0_11, %c0_12] : memref<4x8x1xf32, #tpu.memory_space<vmem>>, vector<1x8x1xf32>
    %12 = vector.shape_cast %11 : vector<1x8x1xf32> to vector<8x1xf32>
    %13 = vector.broadcast %12 : vector<8x1xf32> to vector<8x128xf32>
    %14 = arith.addf %10, %13 : vector<8x128xf32>
    %c0_13 = arith.constant 0 : index
    %c0_14 = arith.constant 0 : index
    %c0_15 = arith.constant 0 : index
    %c0_16 = arith.constant 0 : index
    %15 = vector.load %arg7[%c0_13, %c0_14, %c0_15, %c0_16] : memref<1x4x8x128xf32, #tpu.memory_space<vmem>>, vector<1x1x8x128xf32>
    %16 = vector.shape_cast %15 : vector<1x1x8x128xf32> to vector<8x128xf32>
    %17 = vector.shape_cast %14 : vector<8x128xf32> to vector<1x1x8x128xf32>
    tpu.vector_store %arg7[%c0_13, %c0_14, %c0_15, %c0_16], %17 {strides = array<i32>} : memref<1x4x8x128xf32, #tpu.memory_space<vmem>>, vector<1x1x8x128xf32>,
    %c0_17 = arith.constant 0 : index
    %c1 = arith.constant 1 : index
    %c0_18 = arith.constant 0 : index
    %c0_19 = arith.constant 0 : index
    %18 = vector.load %arg2[%c0_17, %c1, %c0_18, %c0_19] : memref<1x4x8x128xf32, #tpu.memory_space<vmem>>, vector<1x1x8x128xf32>
    %19 = vector.shape_cast %18 : vector<1x1x8x128xf32> to vector<8x128xf32>
    %20 = vector.broadcast %0 : vector<8x1xf32> to vector<8x128xf32>
    %21 = arith.subf %19, %20 : vector<8x128xf32>
    %cst_20 = arith.constant dense<0.000000e+00> : vector<8x128xf32>
    %22 = tpu.matmul %1, %21, %cst_20 {dimension_numbers = #tpu.dot_dimension_numbers<[1], [0], [0], [1], [0, 0, 1, 1], [], []>} : vector<8x8xf32>, vector<8x128xf32>, vector<8x128xf32> -> vector<8x128xf32>
    %c1_21 = arith.constant 1 : index
    %c0_22 = arith.constant 0 : index
    %c0_23 = arith.constant 0 : index
    %23 = vector.load %arg5[%c1_21, %c0_22, %c0_23] : memref<4x8x1xf32, #tpu.memory_space<vmem>>, vector<1x8x1xf32>
    %24 = vector.shape_cast %23 : vector<1x8x1xf32> to vector<8x1xf32>
    %25 = vector.broadcast %24 : vector<8x1xf32> to vector<8x128xf32>
    %26 = arith.mulf %22, %25 : vector<8x128xf32>
    %c1_24 = arith.constant 1 : index
    %c0_25 = arith.constant 0 : index
    %c0_26 = arith.constant 0 : index
    %27 = vector.load %arg6[%c1_24, %c0_25, %c0_26] : memref<4x8x1xf32, #tpu.memory_space<vmem>>, vector<1x8x1xf32>
    %28 = vector.shape_cast %27 : vector<1x8x1xf32> to vector<8x1xf32>
    %29 = vector.broadcast %28 : vector<8x1xf32> to vector<8x128xf32>
    %30 = arith.addf %26, %29 : vector<8x128xf32>
    %c0_27 = arith.constant 0 : index
    %c1_28 = arith.constant 1 : index
    %c0_29 = arith.constant 0 : index
    %c0_30 = arith.constant 0 : index
    %31 = vector.load %arg7[%c0_27, %c1_28, %c0_29, %c0_30] : memref<1x4x8x128xf32, #tpu.memory_space<vmem>>, vector<1x1x8x128xf32>
    %32 = vector.shape_cast %31 : vector<1x1x8x128xf32> to vector<8x128xf32>
    %33 = vector.shape_cast %30 : vector<8x128xf32> to vector<1x1x8x128xf32>
    tpu.vector_store %arg7[%c0_27, %c1_28, %c0_29, %c0_30], %33 {strides = array<i32>} : memref<1x4x8x128xf32, #tpu.memory_space<vmem>>, vector<1x1x8x128xf32>,
    %c0_31 = arith.constant 0 : index
    %c2 = arith.constant 2 : index
    %c0_32 = arith.constant 0 : index
    %c0_33 = arith.constant 0 : index
    %34 = vector.load %arg2[%c0_31, %c2, %c0_32, %c0_33] : memref<1x4x8x128xf32, #tpu.memory_space<vmem>>, vector<1x1x8x128xf32>
    %35 = vector.shape_cast %34 : vector<1x1x8x128xf32> to vector<8x128xf32>
    %36 = vector.broadcast %0 : vector<8x1xf32> to vector<8x128xf32>
    %37 = arith.subf %35, %36 : vector<8x128xf32>
    %cst_34 = arith.constant dense<0.000000e+00> : vector<8x128xf32>
    %38 = tpu.matmul %1, %37, %cst_34 {dimension_numbers = #tpu.dot_dimension_numbers<[1], [0], [0], [1], [0, 0, 1, 1], [], []>} : vector<8x8xf32>, vector<8x128xf32>, vector<8x128xf32> -> vector<8x128xf32>
    %c2_35 = arith.constant 2 : index
    %c0_36 = arith.constant 0 : index
    %c0_37 = arith.constant 0 : index
    %39 = vector.load %arg5[%c2_35, %c0_36, %c0_37] : memref<4x8x1xf32, #tpu.memory_space<vmem>>, vector<1x8x1xf32>
    %40 = vector.shape_cast %39 : vector<1x8x1xf32> to vector<8x1xf32>
    %41 = vector.broadcast %40 : vector<8x1xf32> to vector<8x128xf32>
    %42 = arith.mulf %38, %41 : vector<8x128xf32>
    %c2_38 = arith.constant 2 : index
    %c0_39 = arith.constant 0 : index
    %c0_40 = arith.constant 0 : index
    %43 = vector.load %arg6[%c2_38, %c0_39, %c0_40] : memref<4x8x1xf32, #tpu.memory_space<vmem>>, vector<1x8x1xf32>
    %44 = vector.shape_cast %43 : vector<1x8x1xf32> to vector<8x1xf32>
    %45 = vector.broadcast %44 : vector<8x1xf32> to vector<8x128xf32>
    %46 = arith.addf %42, %45 : vector<8x128xf32>
    %c0_41 = arith.constant 0 : index
    %c2_42 = arith.constant 2 : index
    %c0_43 = arith.constant 0 : index
    %c0_44 = arith.constant 0 : index
    %47 = vector.load %arg7[%c0_41, %c2_42, %c0_43, %c0_44] : memref<1x4x8x128xf32, #tpu.memory_space<vmem>>, vector<1x1x8x128xf32>
    %48 = vector.shape_cast %47 : vector<1x1x8x128xf32> to vector<8x128xf32>
    %49 = vector.shape_cast %46 : vector<8x128xf32> to vector<1x1x8x128xf32>
    tpu.vector_store %arg7[%c0_41, %c2_42, %c0_43, %c0_44], %49 {strides = array<i32>} : memref<1x4x8x128xf32, #tpu.memory_space<vmem>>, vector<1x1x8x128xf32>,
    %c0_45 = arith.constant 0 : index
    %c3 = arith.constant 3 : index
    %c0_46 = arith.constant 0 : index
    %c0_47 = arith.constant 0 : index
    %50 = vector.load %arg2[%c0_45, %c3, %c0_46, %c0_47] : memref<1x4x8x128xf32, #tpu.memory_space<vmem>>, vector<1x1x8x128xf32>
    %51 = vector.shape_cast %50 : vector<1x1x8x128xf32> to vector<8x128xf32>
    %52 = vector.broadcast %0 : vector<8x1xf32> to vector<8x128xf32>
    %53 = arith.subf %51, %52 : vector<8x128xf32>
    %cst_48 = arith.constant dense<0.000000e+00> : vector<8x128xf32>
    %54 = tpu.matmul %1, %53, %cst_48 {dimension_numbers = #tpu.dot_dimension_numbers<[1], [0], [0], [1], [0, 0, 1, 1], [], []>} : vector<8x8xf32>, vector<8x128xf32>, vector<8x128xf32> -> vector<8x128xf32>
    %c3_49 = arith.constant 3 : index
    %c0_50 = arith.constant 0 : index
    %c0_51 = arith.constant 0 : index
    %55 = vector.load %arg5[%c3_49, %c0_50, %c0_51] : memref<4x8x1xf32, #tpu.memory_space<vmem>>, vector<1x8x1xf32>
    %56 = vector.shape_cast %55 : vector<1x8x1xf32> to vector<8x1xf32>
    %57 = vector.broadcast %56 : vector<8x1xf32> to vector<8x128xf32>
    %58 = arith.mulf %54, %57 : vector<8x128xf32>
    %c3_52 = arith.constant 3 : index
    %c0_53 = arith.constant 0 : index
    %c0_54 = arith.constant 0 : index
    %59 = vector.load %arg6[%c3_52, %c0_53, %c0_54] : memref<4x8x1xf32, #tpu.memory_space<vmem>>, vector<1x8x1xf32>
    %60 = vector.shape_cast %59 : vector<1x8x1xf32> to vector<8x1xf32>
    %61 = vector.broadcast %60 : vector<8x1xf32> to vector<8x128xf32>
    %62 = arith.addf %58, %61 : vector<8x128xf32>
    %c0_55 = arith.constant 0 : index
    %c3_56 = arith.constant 3 : index
    %c0_57 = arith.constant 0 : index
    %c0_58 = arith.constant 0 : index
    %63 = vector.load %arg7[%c0_55, %c3_56, %c0_57, %c0_58] : memref<1x4x8x128xf32, #tpu.memory_space<vmem>>, vector<1x1x8x128xf32>
    %64 = vector.shape_cast %63 : vector<1x1x8x128xf32> to vector<8x128xf32>
    %65 = vector.shape_cast %62 : vector<8x128xf32> to vector<1x1x8x128xf32>
    tpu.vector_store %arg7[%c0_55, %c3_56, %c0_57, %c0_58], %65 {strides = array<i32>} : memref<1x4x8x128xf32, #tpu.memory_space<vmem>>, vector<1x1x8x128xf32>,
    return
  }
  func.func @transform_0(%arg0: i32, %arg1: i32) -> (i32, i32, i32, i32) {
    %c0_i32 = arith.constant 0 : i32
    %c0_i32_0 = arith.constant 0 : i32
    %c0_i32_1 = arith.constant 0 : i32
    return %arg0, %arg1, %c0_i32, %c0_i32_0 : i32, i32, i32, i32
  }
  func.func @transform_1(%arg0: i32, %arg1: i32) -> (i32, i32) {
    %c0_i32 = arith.constant 0 : i32
    %c0_i32_0 = arith.constant 0 : i32
    %c0_i32_1 = arith.constant 0 : i32
    return %c0_i32, %c0_i32_0 : i32, i32
  }
  func.func @transform_2(%arg0: i32, %arg1: i32) -> (i32, i32) {
    %c0_i32 = arith.constant 0 : i32
    %c0_i32_0 = arith.constant 0 : i32
    %c0_i32_1 = arith.constant 0 : i32
    return %c0_i32, %c0_i32_0 : i32, i32
  }
  func.func @transform_3(%arg0: i32, %arg1: i32) -> (i32, i32, i32) {
    %c0_i32 = arith.constant 0 : i32
    %c0_i32_0 = arith.constant 0 : i32
    %c0_i32_1 = arith.constant 0 : i32
    return %arg1, %c0_i32, %c0_i32_0 : i32, i32, i32
  }
  func.func @transform_4(%arg0: i32, %arg1: i32) -> (i32, i32, i32) {
    %c0_i32 = arith.constant 0 : i32
    %c0_i32_0 = arith.constant 0 : i32
    %c0_i32_1 = arith.constant 0 : i32
    return %arg1, %c0_i32, %c0_i32_0 : i32, i32, i32
  }
  func.func @transform_5(%arg0: i32, %arg1: i32) -> (i32, i32, i32, i32) {
    %c0_i32 = arith.constant 0 : i32
    %c0_i32_0 = arith.constant 0 : i32
    %c0_i32_1 = arith.constant 0 : i32
    return %arg0, %arg1, %c0_i32, %c0_i32_0 : i32, i32, i32, i32
  }
}

</mosaic_0001>

<bundles_post_ra>
// kernel: batch_group_itn.3
= control target key start
LH: loop header
LB: loop body
LE: loop exit
PB: predicated region body
PF: predicated region fallthrough
CT: control target
= control target key end

     0   :  { %10 = vsyncpa [#allocation3], 0  ;;  %s1183_s0 = inlined_call_operand.vmem [shape: f32[2,4,8,128], index: 0, kind: input, shape index: {}]   ;;  %s1184_s1 = inlined_call_operand.vmem [shape: f32[8,1], index: 1, kind: input, shape index: {}]   ;;  %s1185_s2 = inlined_call_operand.vmem [shape: f32[8,8], index: 2, kind: input, shape index: {}]   ;;  %s1186_s3 = inlined_call_operand.vmem [shape: f32[4,8,1], index: 3, kind: input, shape index: {}]   ;;  %s1187_s4 = inlined_call_operand.vmem [shape: f32[4,8,1], index: 4, kind: input, shape index: {}]   ;;  %s1188_s5 = inlined_call_operand.hbm [shape: f32[2,4,8,128], index: 5, kind: output, shape index: {}]  }
   0x1   :  { %12 = vsyncpa [#allocation3 + $0x1], 0  ;;  %s1031_s18 = smov 0   ;;  %s1033_s19 = smov 0  }
   0x2   :  { %s1035_s20 = smov 0   ;;  %s1037_s21 = smov 0  }
   0x3   :  { %s1039_s22 = smov 0   ;;  %s1041_s23 = smov 0  }
   0x4 LB: > { %s794_s24 = sadd.s32 4294967295, %s993_s23   ;;  %s795_s25 = sadd.s32 4294967294, %s993_s23   ;;  %s993_s23 = sphi %s1041_s23, %s18_s23   ;;  %s989_s22 = sphi %s1039_s22, %s1195_s22   ;;  %s985_s21 = sphi %s1037_s21, %s1194_s21   ;;  %s981_s20 = sphi %s1035_s20, %s1193_s20   ;;  %s977_s19 = sphi %s1033_s19, %s1192_s19   ;;  %s973_s18 = sphi %s1031_s18, %s1191_s18  }
   0x5   : > { %s30_s26 = sadd.s32 1, %s989_s22  ;;  %s161_s27 = sadd.s32 1, %s981_s20 }
   0x6   : > { %p32_p0 = scmp.ge.s32.totalorder %s30_s26, 2  ;;  %p171_p1 = scmp.ne.s32.totalorder %s981_s20, %s977_s19 }
   0x7   : > { %p172_p2 = scmp.eq.s32.totalorder %s794_s24, 1  ;;  %p177_p3 = scmp.ne.s32.totalorder %s977_s19, %s973_s18 }
   0x8   : > { %s1197_s26 = smov (%p32_p0, %s30_s26), 0  ;;  %p178_p5 = scmp.eq.s32.totalorder %s795_s25, 1 }
   0x9   : > { %p1071_p4 = por %p172_p2, %p171_p1  ;;  %s156_s29 = ssub.s32 %s989_s22, %s1197_s26 }
   0xa   : > { %p800_p6 = scmp.ge.s32.totalorder %s993_s23, 1  ;;  %p159_p7 = scmp.eq.s32.totalorder %s156_s29, 0 }
   0xb   : > { %p1078_p8 = por %p178_p5, %p177_p3  ;;  %p233_p9 = scmp.lt.s32.totalorder %s993_s23, 3 }
   0xc   : > { %s1084_s6 = scalar_select %p159_p7, %s981_s20, %s161_s27  }
   0xd   : > { %p234_p10 = pnand %p800_p6, %p233_p9 }
   0xe   : > { %p276_p11 = scmp.lt.s32.totalorder (!%p234_p10), %s985_s21, 1  ;;  %s272_s17 = sand.u32 (!%p234_p10), 1, %s977_s19  }
   0xf   : > { %237 = sbr.rel (%p234_p10) target bundleno = 364 (0x16c), region = 40  ;;  %s801_s24 = sshll.u32 (!%p234_p10), %s272_s17, 5 }
  0x10   : > { %s274_s25 = scalar_lea.vmem (!%p234_p10), [#allocation2], %s801_s24  ;;  %s826_s29 = sshll.u32 (!%p234_p10), %s985_s21, 9 }
  0x11   : > { %s685_s27 = sshll.u32 (!%p234_p10), %s274_s25, 4  ;;  %s1138_s9 = scalar_lea.sflag (!%p234_p10), [#allocation3], %s272_s17  ;;  %s1129_s27 = int_to_ptr.vmem [resolvable:$true] %s685_s27 }
  0x14   : > { %v298_v0 = vld [vmem:[%s1184_s1] sm:$0xff]  ;;  %v995_v1 = vmov 0   ;;  %v996_v2 = vmov 0.0   ;;  %vm997_vm0 = vmmov 0   ;;  %v817_v4 = vld [vmem:[%s1186_s3 + $0x18] sm:$0xff]  ;;  %v808_v5 = vld [vmem:[%s1187_s4 + $0x8] sm:$0xff] }
  0x15   : > { %915 = vset.pattern.permute.xlu0 %v995_v1  ;;  %835 = vmatprep.subr.mxu0 %v996_v2  ;;  %v381_v3 = vld [vmem:[%s1186_s3] sm:$0xff]  ;;  %v807_v6 = vld [vmem:[%s1186_s3 + $0x8] sm:$0xff]  ;;  %v818_v7 = vld [vmem:[%s1187_s4 + $0x18] sm:$0xff]  ;;  %s277_s10 = scalar_select %p276_p11, %s985_s21, 1  ;;  %vm307_vm1 = vcmask 64512  }
  0x16   : > { %303 = vperm.xlu0 %915, %v298_v0   ;;  %840 = vmatprep.subr.mxu1 %v996_v2  ;;  %v812_v8 = vld [vmem:[%s1186_s3 + $0x10] sm:$0xff]  ;;  %v388_v9 = vld [vmem:[%s1187_s4] sm:$0xff]  ;;  %s1134_s21 = scalar_lea.hbm %s1188_s5, %s826_s29 }
  0x17   : > { %837 = vmatprep.mubr.msk.f32.mxu0 %vm997_vm0, %v996_v2  ;;  %842 = vmatprep.mubr.msk.f32.mxu1 %vm997_vm0, %v996_v2  ;;  %v813_v10 = vld [vmem:[%s1187_s4 + $0x10] sm:$0xff]  ;;  %s825_s11 = sshll.u32 %s277_s10, 5  ;;  %v299_v18 = vld [vmem:[%s1185_s2] sm:$0xff]  ;;  %s917_s10 = scalar_lea.vmem %s1129_s27, 512 }
  0x18   : > { %916 = vset.pattern.permute.xlu1 %v995_v1  ;;  %s283_s14 = scalar_lea.vmem %s1183_s0, %s825_s11  ;;  %p918_p12 = scmp.ne.s32.totalorder %s1129_s27, %s917_s10 }
  0x19   : > { %473 = vperm.xlu1 %916, %v807_v6   ;;  %v300_v11 = vld [vmem:[%s283_s14] sm:$0xff]  ;;  %v805_v12 = vld [vmem:[%s283_s14 + $0x8] sm:$0xff]  ;;  %v810_v14 = vld [vmem:[%s283_s14 + $0x10] sm:$0xff]  ;;  %s998_s11 = smov [#allocation2]  }
  0x1a   : > { %384 = vperm.xlu0 %915, %v381_v3   ;;  %v815_v15 = vld [vmem:[%s283_s14 + $0x18] sm:$0xff]  ;;  %p919_p13 = pnand %p918_p12, %p1071_p4  ;;  %s921_s12 = sshll.u32 %s998_s11, 4  ;;  %s922_s12 = int_to_ptr.vmem [resolvable:$false] %s921_s12 }
  0x1b   : > { %s923_s13 = scalar_lea.vmem %s922_s12, 1024  ;;  %p924_p1 = scmp.lt.s32.totalorder %s1129_s27, %s922_s12 }
  0x1c   : > { %p920_p0 = pneg %p919_p13  ;;  %p925_p2 = scmp.lt.s32.totalorder %s923_s13, %s917_s10 }
  0x1d   : > { %564 = vperm.xlu1 %916, %v812_v8  }
  0x1e   : > { %655 = vperm.xlu0 %915, %v817_v4   ;;  %p926_p3 = por %p925_p2, %p924_p1 }
  0x20   : > { %p927_p5 = pnand %p926_p3, %p920_p0 }
  0x21   : > { %391 = vperm.xlu1 %916, %v388_v9  }
  0x22   : > { %481 = vperm.xlu0 %915, %v808_v5  }
  0x25   : > { %572 = vperm.xlu1 %916, %v813_v10  }
  0x26   : > { %663 = vperm.xlu0 %915, %v818_v7  }
  0x91   : > { %v304_v13 = vpop.permute.xlu0 %303 }
  0x92   : > { %v306_v16 = vsub.f32 %v300_v11, %v304_v13  ;;  %v398_v17 = vsub.f32 %v805_v12, %v304_v13  ;;  %v489_v19 = vsub.f32 %v810_v14, %v304_v13  ;;  %v580_v20 = vsub.f32 %v815_v15, %v304_v13 }
  0x94   : > { %836 = vmatpush3.msra.mxu0 %v306_v16  ;;  %841 = vmatpush3.msra.mxu1 %v398_v17  ;;  %v474_v22 = vpop.permute.xlu1 %473 }
  0x95   : > { %838 = vmatmul.mubr.msk.f32.vlgmr.msra.gmra.mxu0 %vm307_vm1, %v299_v18  ;;  %843 = vmatmul.mubr.msk.f32.vlgmr.msra.gmra.mxu1 %vm307_vm1, %v299_v18  ;;  %v385_v21 = vpop.permute.xlu0 %384 }
  0x96   : > { %845 = vmatprep.subr.mxu0 %v996_v2  ;;  %850 = vmatprep.subr.mxu1 %v996_v2 }
  0x97   : > { %846 = vmatpush3.msra.mxu0 %v489_v19  ;;  %851 = vmatpush3.msra.mxu1 %v580_v20 }
  0x98   : > { %847 = vmatprep.mubr.msk.f32.mxu0 %vm997_vm0, %v996_v2  ;;  %852 = vmatprep.mubr.msk.f32.mxu1 %vm997_vm0, %v996_v2  ;;  %v565_v24 = vpop.permute.xlu1 %564 }
  0x99   : > { %848 = vmatmul.mubr.msk.f32.vlgmr.msra.gmra.mxu0 %vm307_vm1, %v299_v18  ;;  %853 = vmatmul.mubr.msk.f32.vlgmr.msra.gmra.mxu1 %vm307_vm1, %v299_v18  ;;  %v656_v23 = vpop.permute.xlu0 %655 }
  0x9c   : > { %v392_v26 = vpop.permute.xlu1 %391 }
  0x9d   : > { %v482_v25 = vpop.permute.xlu0 %481 }
  0xa0   : > { %v573_v38 = vpop.permute.xlu1 %572 }
  0xa1   : > { %v664_v37 = vpop.permute.xlu0 %663 }
 0x155   : > { %v377_v27 = vpop.f32.mrf.mxu0  ;;  %v465_v28 = vpop.f32.mrf.mxu1 }
 0x156   : > { %v387_v29 = vmul.f32 %v385_v21, %v377_v27  ;;  %v476_v30 = vmul.f32 %v474_v22, %v465_v28 }
 0x157   : > { %v839_v31 = vpop.f32.mrf.mxu0  ;;  %v844_v32 = vpop.f32.mrf.mxu1 }
 0x158   : > { %v394_v33 = vadd.f32 %v392_v26, %v387_v29  ;;  %v484_v34 = vadd.f32 %v482_v25, %v476_v30 }
 0x159   : > { %v556_v35 = vpop.f32.mrf.mxu0  ;;  %v647_v36 = vpop.f32.mrf.mxu1 }
 0x15a   : > { %395 = vst [vmem:[%s274_s25] sm:$0xff] %v394_v33  ;;  %809 = vst [vmem:[%s274_s25 + $0x8] sm:$0xff] %v484_v34  ;;  %v567_v39 = vmul.f32 %v565_v24, %v556_v35  ;;  %v658_v40 = vmul.f32 %v656_v23, %v647_v36 }
 0x15b   : > { %v849_v41 = vpop.f32.mrf.mxu0  ;;  %v854_v42 = vpop.f32.mrf.mxu1 }
 0x15c   : > { %v575_v43 = vadd.f32 %v573_v38, %v567_v39  ;;  %v666_v44 = vadd.f32 %v664_v37, %v658_v40 }
 0x15e   : > { %814 = vst [vmem:[%s274_s25 + $0x10] sm:$0xff] %v575_v43  ;;  %819 = vst [vmem:[%s274_s25 + $0x18] sm:$0xff] %v666_v44 }
 0x15f   : > { %930 = shalt.err (!%p927_p5)
}
 0x160   : > { %s931_s14 = scalar_lea.hbm %s1134_s21, 512  ;;  %s935_s17 = scalar_lea.hbm %s1188_s5, 1024 }
 0x161   : > { %p932_p6 = scmp.ne.s32.totalorder %s1134_s21, %s931_s14  ;;  %p936_p10 = scmp.lt.s32.totalorder %s1134_s21, %s1188_s5 }
 0x162   : > { %p937_p11 = scmp.lt.s32.totalorder %s935_s17, %s931_s14 }
 0x163   : > { %p933_p7 = pnand %p932_p6, %p1071_p4 }
 0x164   : > { %p938_p12 = por %p937_p11, %p936_p10 }
 0x165   : > { %p934_p9 = pneg %p933_p7 }
 0x167   : > { %p939_p13 = pnand %p938_p12, %p934_p9 }
 0x169   : > { %942 = shalt.err (!%p939_p13)
}
 0x16a   : > { %s999_s29 = smov 128   ;;  %s1000_s7 = smov 8  }
 0x16b   : > { %855 = dma.vmem_to_hbm [thread:$0]  (%p1071_p4), %s1129_s27, 512, %s1134_s21, %s1138_s9, %s999_s29, %s999_s29, %s1000_s7  }
 0x16c PF: > { %p861_p0 = scmp.ge.s32.totalorder %s993_s23, 2  ;;  %s700_s8 = sand.u32 1, %s973_s18  }
 0x16d   : > { %s701_s10 = scalar_lea.sflag [#allocation3], %s700_s8 }
 0x16e   : > { %p858_p1 = pnand %p861_p0, %p1078_p8 }
 0x170   : > { %p859_p2 = pneg %p858_p1 }
 0x172   : > { %968 = dma.done.wait (%p859_p2), %s701_s10, 512  }
 0x173   : > { %970 = vsyncadd (%p859_p2), %s701_s10, 4294966784  ;;  %s18_s23 = sadd.s32 1, %s993_s23   ;;  %s1191_s18 = smov %s977_s19 }
 0x174   : > { %p15_p3 = scmp.ge.s32.totalorder %s18_s23, 4   ;;  %s1192_s19 = smov %s981_s20 }
 0x175   : > { %s1193_s20 = smov %s1084_s6  ;;  %s1194_s21 = smov %s989_s22 }
 0x176   : > { %s1195_s22 = smov %s1197_s26  ;;  %17 = sbr.rel (!%p15_p3) target bundleno = 4 (0x4), region = 93 }
 0x17b   :  { %706 = vsyncpa [#allocation3], 1 }
 0x17c   :  { %708 = vsyncpa [#allocation3 + $0x1], 1 }

// kernel: batch_group_itn.2
= control target key start
LH: loop header
LB: loop body
LE: loop exit
PB: predicated region body
PF: predicated region fallthrough
CT: control target
= control target key end

     0   :  { %9 = vsyncpa [#allocation3], 0  ;;  %s756_s12 = smov [#allocation2]   ;;  %s836_s0 = inlined_call_operand.vmem [shape: f32[8,1], index: 0, kind: input, shape index: {}]   ;;  %s837_s1 = inlined_call_operand.hbm [shape: f32[8,8,128], index: 1, kind: input, shape index: {}]   ;;  %s838_s2 = inlined_call_operand.vmem [shape: f32[8,1], index: 2, kind: output, shape index: {0}]   ;;  %s839_s3 = inlined_call_operand.vmem [shape: f32[8,8], index: 3, kind: output, shape index: {1}]  }
   0x1   :  { %s17_s13 = sshll.u32 %s756_s12, 4  ;;  %s18_s13 = int_to_ptr.vmem [resolvable:$true] %s17_s13 }
   0x2   :  { %s742_s14 = scalar_lea.vmem %s18_s13, 1024  ;;  %p747_p1 = scmp.lt.s32.totalorder %s18_s13, %s18_s13 }
   0x3   :  { %p743_p0 = scmp.ne.s32.totalorder %s18_s13, %s742_s14  ;;  %p748_p2 = scmp.lt.s32.totalorder %s742_s14, %s742_s14 }
   0x5   :  { %p749_p3 = por %p748_p2, %p747_p1 }
   0x7   :  { %p750_p4 = pnand %p749_p3, %p743_p0 }
   0x9   :  { %753 = shalt.err (!%p750_p4)
}
   0xa   :  { %s757_s15 = smov 128   ;;  %s758_s16 = smov 8  }
   0xb   :  { %23 = dma.hbm_to_vmem [thread:$0]  %s837_s1, 1024, %s18_s13, [#allocation3], %s757_s15, %s757_s15, %s758_s16  }
   0xc   :  { %754 = dma.done.wait [#allocation3], 1024  }
   0xd   :  { %755 = vsyncadd [#allocation3], 4294966272  ;;  %v759_v0 = vmov 0   ;;  %v760_v1 = vmov 0.0   ;;  %v35_v2 = vld [vmem:[%s836_s0] sm:$0xff]  ;;  %vm761_vm0 = vmmov 0  }
   0xe   :  { %733 = vset.pattern.permute.xlu0 %v759_v0  ;;  %687 = vmatprep.subr.mxu0 %v760_v1  ;;  %v47_v3 = vld [vmem:[#allocation2 + $0x8] sm:$0xff]  ;;  %v36_v4 = vld [vmem:[#allocation2] sm:$0xff]  ;;  %v193_v8 = vld [vmem:[#allocation2 + $0x10] sm:$0xff]  ;;  %vm31_vm1 = vcmask 7168   ;;  %vm33_vm2 = vcmask 64512  }
   0xf   :  { %692 = vmatprep.subr.mxu1 %v760_v1  ;;  %39 = vperm.xlu0 %733, %v35_v2   ;;  %v270_v9 = vld [vmem:[#allocation2 + $0x18] sm:$0xff]  ;;  %v347_v12 = vld [vmem:[#allocation2 + $0x20] sm:$0xff]  ;;  %v424_v13 = vld [vmem:[#allocation2 + $0x28] sm:$0xff]  ;;  %32 = vst.msk [vmem:[%s838_s2] sm:$0xff] %vm31_vm1, %v760_v1 }
  0x10   :  { %689 = vmatprep.mubr.msk.f32.mxu0 %vm761_vm0, %v760_v1  ;;  %694 = vmatprep.mubr.msk.f32.mxu1 %vm761_vm0, %v760_v1  ;;  %v501_v16 = vld [vmem:[#allocation2 + $0x30] sm:$0xff]  ;;  %v578_v17 = vld [vmem:[#allocation2 + $0x38] sm:$0xff]  ;;  %34 = vst.msk [vmem:[%s839_s3] sm:$0xff] %vm33_vm2, %v760_v1 }
  0x16   :  { %v654_v34 = vld [vmem:[%s838_s2] sm:$0xff] }
  0x17   :  { %v658_v57 = vld [vmem:[%s839_s3] sm:$0xff] }
  0x8a   :  { %v40_v5 = vpop.permute.xlu0 %39 }
  0x8b   :  { %v48_v6 = vsub.f32 %v47_v3, %v40_v5  ;;  %v42_v7 = vsub.f32 %v36_v4, %v40_v5  ;;  %v194_v10 = vsub.f32 %v193_v8, %v40_v5  ;;  %v271_v11 = vsub.f32 %v270_v9, %v40_v5 }
  0x8c   :  { %v348_v14 = vsub.f32 %v347_v12, %v40_v5  ;;  %v425_v15 = vsub.f32 %v424_v13, %v40_v5  ;;  %v502_v18 = vsub.f32 %v501_v16, %v40_v5  ;;  %v579_v19 = vsub.f32 %v578_v17, %v40_v5 }
  0x8d   :  { %49 = vadd.xlane.f32.xlu1 %v48_v6  ;;  %688 = vmatpush3.xpose.msra.mxu0 %v48_v6 }
  0x8e   :  { %43 = vadd.xlane.f32.xlu0 %v42_v7  ;;  %693 = vmatpush3.xpose.msra.mxu1 %v42_v7 }
  0x8f   :  { %697 = vmatprep.subr.mxu0 %v760_v1  ;;  %702 = vmatprep.subr.mxu1 %v760_v1 }
  0x90   :  { %690 = vmatmul.mubr.f32.vlgmr.msra.gmra.mxu0 %v48_v6 }
  0x91   :  { %695 = vmatmul.mubr.f32.vlgmr.msra.gmra.mxu1 %v42_v7  ;;  %195 = vadd.xlane.f32.xlu1 %v194_v10 }
  0x92   :  { %698 = vmatpush3.xpose.msra.mxu0 %v194_v10  ;;  %703 = vmatpush3.xpose.msra.mxu1 %v271_v11 }
  0x93   :  { %699 = vmatprep.mubr.msk.f32.mxu0 %vm761_vm0, %v760_v1  ;;  %704 = vmatprep.mubr.msk.f32.mxu1 %vm761_vm0, %v760_v1 }
  0x94   :  { %707 = vmatprep.subr.mxu0 %v760_v1  ;;  %712 = vmatprep.subr.mxu1 %v760_v1 }
  0x95   :  { %700 = vmatmul.mubr.f32.vlgmr.msra.gmra.mxu0 %v194_v10  ;;  %705 = vmatmul.mubr.f32.vlgmr.msra.gmra.mxu1 %v271_v11 }
  0x96   :  { %272 = vadd.xlane.f32.xlu1 %v271_v11  ;;  %708 = vmatpush3.xpose.msra.mxu0 %v348_v14 }
  0x97   :  { %713 = vmatpush3.xpose.msra.mxu1 %v425_v15  ;;  %709 = vmatprep.mubr.msk.f32.mxu0 %vm761_vm0, %v760_v1 }
  0x98   :  { %714 = vmatprep.mubr.msk.f32.mxu1 %vm761_vm0, %v760_v1  ;;  %717 = vmatprep.subr.mxu0 %v760_v1 }
  0x99   :  { %710 = vmatmul.mubr.f32.vlgmr.msra.gmra.mxu0 %v348_v14  ;;  %722 = vmatprep.subr.mxu1 %v760_v1 }
  0x9a   :  { %715 = vmatmul.mubr.f32.vlgmr.msra.gmra.mxu1 %v425_v15  ;;  %349 = vadd.xlane.f32.xlu1 %v348_v14 }
  0x9b   :  { %718 = vmatpush3.xpose.msra.mxu0 %v502_v18  ;;  %723 = vmatpush3.xpose.msra.mxu1 %v579_v19 }
  0x9c   :  { %719 = vmatprep.mubr.msk.f32.mxu0 %vm761_vm0, %v760_v1  ;;  %724 = vmatprep.mubr.msk.f32.mxu1 %vm761_vm0, %v760_v1 }
  0x9e   :  { %720 = vmatmul.mubr.f32.vlgmr.msra.gmra.mxu0 %v502_v18  ;;  %725 = vmatmul.mubr.f32.vlgmr.msra.gmra.mxu1 %v579_v19 }
  0x9f   :  { %426 = vadd.xlane.f32.xlu1 %v425_v15 }
  0xa3   :  { %503 = vadd.xlane.f32.xlu1 %v502_v18 }
  0xa7   :  { %580 = vadd.xlane.f32.xlu1 %v579_v19 }
 0x116   :  { %v50_v20 = vpop.xlane.xlu1 %49 }
 0x117   :  { %v44_v23 = vpop.xlane.xlu0 %43 }
 0x118   :  { %v51_v25 = vadd.f32 %v50_v20, %v44_v23 }
 0x11a   :  { %v196_v21 = vpop.xlane.xlu1 %195 }
 0x11b   :  { %v197_v26 = vadd.f32 %v196_v21, %v51_v25 }
 0x11f   :  { %v273_v22 = vpop.xlane.xlu1 %272 }
 0x120   :  { %v274_v28 = vadd.f32 %v273_v22, %v197_v26 }
 0x123   :  { %v350_v24 = vpop.xlane.xlu1 %349 }
 0x124   :  { %v351_v29 = vadd.f32 %v350_v24, %v274_v28 }
 0x128   :  { %v427_v27 = vpop.xlane.xlu1 %426 }
 0x129   :  { %v428_v31 = vadd.f32 %v427_v27, %v351_v29 }
 0x12c   :  { %v504_v30 = vpop.xlane.xlu1 %503 }
 0x12d   :  { %v505_v32 = vadd.f32 %v504_v30, %v428_v31 }
 0x130   :  { %v581_v33 = vpop.xlane.xlu1 %580 }
 0x131   :  { %v582_v35 = vadd.f32 %v581_v33, %v505_v32 }
 0x133   :  { %v655_v36 = vadd.f32 %v654_v34, %v582_v35 }
 0x135   :  { %657 = vst.msk [vmem:[%s838_s2] sm:$0xff] %vm31_vm1, %v655_v36 }
 0x150   :  { %v118_v37 = vpop.f32.mrf.mxu0 }
 0x151   :  { %v188_v38 = vpop.f32.mrf.mxu1 }
 0x152   :  { %v691_v39 = vpop.f32.mrf.mxu0  ;;  %v189_v41 = vadd.f32 %v188_v38, %v118_v37 }
 0x153   :  { %v696_v40 = vpop.f32.mrf.mxu1 }
 0x155   :  { %v264_v42 = vpop.f32.mrf.mxu0  ;;  %v341_v43 = vpop.f32.mrf.mxu1 }
 0x156   :  { %v268_v44 = vadd.f32 %v264_v42, %v189_v41 }
 0x157   :  { %v701_v45 = vpop.f32.mrf.mxu0  ;;  %v706_v46 = vpop.f32.mrf.mxu1 }
 0x158   :  { %v345_v47 = vadd.f32 %v341_v43, %v268_v44 }
 0x159   :  { %v418_v48 = vpop.f32.mrf.mxu0 }
 0x15a   :  { %v422_v49 = vadd.f32 %v418_v48, %v345_v47  ;;  %v495_v50 = vpop.f32.mrf.mxu1 }
 0x15b   :  { %v711_v51 = vpop.f32.mrf.mxu0 }
 0x15c   :  { %v499_v52 = vadd.f32 %v495_v50, %v422_v49  ;;  %v716_v53 = vpop.f32.mrf.mxu1 }
 0x15e   :  { %v572_v54 = vpop.f32.mrf.mxu0  ;;  %v649_v55 = vpop.f32.mrf.mxu1 }
 0x15f   :  { %v576_v56 = vadd.f32 %v572_v54, %v499_v52 }
 0x160   :  { %v721_v58 = vpop.f32.mrf.mxu0  ;;  %v726_v59 = vpop.f32.mrf.mxu1 }
 0x161   :  { %v653_v60 = vadd.f32 %v649_v55, %v576_v56 }
 0x163   :  { %v659_v61 = vadd.f32 %v658_v57, %v653_v60 }
 0x165   :  { %661 = vst.msk [vmem:[%s839_s3] sm:$0xff] %vm33_vm2, %v659_v61 }
 0x166   :  { %670 = vsyncpa [#allocation3], 1 }

</bundles_post_ra>
